<compile_context>
chip_gen: v5e
topology: v5e:2x2
jax: 0.10.0
libtpu: 0.0.40
codegen_flags: <defaults>
</compile_context>

<pallas_src>
import jax
import jax.numpy as jnp
import numpy as np
from jax import lax
from jax.experimental import pallas as pl
from jax.experimental.pallas import tpu as pltpu


def _round_up(x, m):
    return ((x + m - 1) // m) * m


def make_rnn_recurrence_kernel(t_chunk, unroll):
    """Runs `t_chunk` RNN steps per grid invocation.

    The hidden state is carried across chunks in VMEM scratch.  The input
    projection (and bias) is precomputed outside the kernel, so the serial
    dependency chain per step is just: MXU matmul -> VPU add -> EUP tanh.
    """

    def kernel(xh_ref, whh_ref, h0_ref, h_seq_ref, h_scratch):
        c = pl.program_id(0)

        @pl.when(c == 0)
        def _():
            h_scratch[...] = h0_ref[...]

        # Hoisted out of the time loop (JAX does not CSE loads/broadcasts).
        whh = whh_ref[...]                       # (hidden_p, hidden_p)

        def step(i, h_prev):
            h_new = jnp.tanh(
                xh_ref[i]                        # (batch_p, hidden_p), prefetched chunk
                + jnp.dot(h_prev, whh, preferred_element_type=jnp.float32))
            h_seq_ref[i] = h_new
            return h_new

        h_last = lax.fori_loop(0, t_chunk, step, h_scratch[...], unroll=unroll)
        h_scratch[...] = h_last                  # carry into next chunk

    return kernel


def dense_head_kernel(h_ref, w_ref, b_ref, y_ref):
    """logits tile = H_tile @ W_hq_tile + b_q_tile  (fully parallel)."""
    y_ref[...] = (jnp.dot(h_ref[...], w_ref[...],
                          preferred_element_type=jnp.float32)
                  + b_ref[...]).astype(y_ref.dtype)


def rnn_model_forward(inputs, state, params, vocab_size):
    """inputs: int32 (seq, batch) token ids; state: f32 (batch, hidden).
    Returns (logits (seq*batch, vocab), final_state (batch, hidden))."""
    seq, batch = inputs.shape
    hidden = state.shape[-1]
    wxh, whh, bh, whq, bq = params

    # ---- TPU-friendly padding (lane=128 / sublane=8); padded rows/cols are
    # ---- zero, stay zero through the recurrence, and are sliced off at the end.
    hidden_p = _round_up(hidden, 128)
    batch_p = _round_up(batch, 8)

    # Robust time chunking: pad seq up to a multiple of t_chunk (padded steps
    # only occur AFTER real ones, so they never affect kept outputs).
    t_chunk = min(64, seq)
    seq_p = _round_up(seq, t_chunk)
    n_chunks = seq_p // t_chunk
    unroll = min(8, t_chunk)

    # ---- input projection, hoisted off the serial path ------------------------
    # xh[t, b, :] = W_xh[tok[t, b], :] + b_h  (one parallel gather over all
    # positions; one-hot matmul is never materialized).
    tok_p = jnp.pad(inputs.astype(jnp.int32),
                    ((0, seq_p - seq), (0, batch_p - batch)))
    xw_table = jnp.pad(wxh + bh,                            # fold bias into table
                       ((0, 0), (0, hidden_p - hidden))).astype(jnp.float32)
    xh_all = jnp.take(xw_table, tok_p.reshape(-1), axis=0)
    xh_all = xh_all.reshape(seq_p, batch_p, hidden_p)

    h0_p = jnp.pad(state.astype(jnp.float32),
                   ((0, batch_p - batch), (0, hidden_p - hidden)))
    whh_p = jnp.pad(whh, ((0, hidden_p - hidden), (0, hidden_p - hidden))
                    ).astype(jnp.float32)

    # ---- recurrent part: time-chunked serial grid ------------------------------
    kernel = make_rnn_recurrence_kernel(t_chunk, unroll)
    h_all = pl.pallas_call(
        kernel,
        out_shape=jax.ShapeDtypeStruct((seq_p, batch_p, hidden_p), jnp.float32),
        grid_spec=pltpu.PrefetchScalarGridSpec(
            num_scalar_prefetch=0,
            grid=(n_chunks,),
            in_specs=[
                pl.BlockSpec((t_chunk, batch_p, hidden_p), lambda c: (c, 0, 0)),  # xh chunk
                pl.BlockSpec((hidden_p, hidden_p), lambda c: (0, 0)),             # W_hh
                pl.BlockSpec((batch_p, hidden_p), lambda c: (0, 0)),              # h0
            ],
            out_specs=pl.BlockSpec((t_chunk, batch_p, hidden_p), lambda c: (c, 0, 0)),
            scratch_shapes=[pltpu.VMEM((batch_p, hidden_p), jnp.float32)],
        ),
        compiler_params=pltpu.CompilerParams(
            dimension_semantics=("arbitrary",)),   # sequential recurrence
    )(xh_all, whh_p, h0_p)

    # ---- dense head: lane-dense matmul tiled over rows AND vocab ---------------
    m = seq_p * batch_p
    h_flat = h_all.reshape(m, hidden_p)
    tm = min(512, m)
    m_p = _round_up(m, tm)
    if m_p != m:
        h_flat = jnp.pad(h_flat, ((0, m_p - m), (0, 0)))

    tn = min(512, _round_up(vocab_size, 128))      # multiple of 128
    vocab_p = _round_up(vocab_size, tn)            # multiple of tn
    whq_p = jnp.pad(whq, ((0, hidden_p - hidden), (0, vocab_p - vocab_size))
                    ).astype(jnp.float32)
    bq_p = jnp.pad(bq, ((0, 0), (0, vocab_p - vocab_size))).astype(jnp.float32)

    logits_p = pl.pallas_call(
        dense_head_kernel,
        out_shape=jax.ShapeDtypeStruct((m_p, vocab_p), jnp.float32),
        grid=(m_p // tm, vocab_p // tn),
        in_specs=[
            pl.BlockSpec((tm, hidden_p), lambda i, j: (i, 0)),
            pl.BlockSpec((hidden_p, tn), lambda i, j: (0, j)),
            pl.BlockSpec((1, tn), lambda i, j: (0, j)),
        ],
        out_specs=pl.BlockSpec((tm, tn), lambda i, j: (i, j)),
        compiler_params=pltpu.CompilerParams(
            dimension_semantics=("parallel", "parallel")),  # shards across v7x TCs
    )(h_flat, whq_p, bq_p)

    # ---- strip padding (glue) ---------------------------------------------------
    logits = logits_p[:m].reshape(seq_p, batch_p, vocab_p)[:seq, :batch, :vocab_size]
    logits = logits.reshape(seq * batch, vocab_size)
    h_out = h_all[seq - 1, :batch, :hidden]        # last REAL step, never padded
    return logits, h_out


def reference_forward(inputs, state, params, vocab_size):
    """Pure-JAX reference (mirrors the PyTorch one-hot + nn.RNN + Linear tail)."""
    wxh, whh, bh, whq, bq = params
    x = jax.nn.one_hot(inputs, vocab_size, dtype=jnp.float32)
    h = state
    ys = []
    for t in range(inputs.shape[0]):
        h = jnp.tanh(x[t] @ wxh + h @ whh + bh)
        ys.append(h @ whq + bq)
    y = jnp.stack(ys)
    return y.reshape(-1, vocab_size), h


if __name__ == "__main__":
    seq, batch, vocab_size, hidden = 8, 2, 32, 32

    key = jax.random.PRNGKey(0)
    k_in, k1, k2, k3, k4, k5 = jax.random.split(key, 6)

    inputs = jax.random.randint(k_in, (seq, batch), 0, vocab_size, dtype=jnp.int32)
    state = jnp.zeros((batch, hidden), jnp.float32)

    scale = 0.1
    params = (
        scale * jax.random.normal(k1, (vocab_size, hidden), jnp.float32),  # W_xh
        scale * jax.random.normal(k2, (hidden, hidden), jnp.float32),      # W_hh
        scale * jax.random.normal(k3, (1, hidden), jnp.float32),           # b_h
        scale * jax.random.normal(k4, (hidden, vocab_size), jnp.float32),  # W_hq
        scale * jax.random.normal(k5, (1, vocab_size), jnp.float32),       # b_q
    )

    logits, h_final = rnn_model_forward(inputs, state, params, vocab_size)
    jax.block_until_ready((logits, h_final))

    logits_ref, h_ref = reference_forward(inputs, state, params, vocab_size)
    np.testing.assert_allclose(np.asarray(logits), np.asarray(logits_ref),
                               rtol=1e-5, atol=1e-5)
    np.testing.assert_allclose(np.asarray(h_final), np.asarray(h_ref),
                               rtol=1e-5, atol=1e-5)

    print("KERNEL_OK")
</pallas_src>

<mosaic_0001>
module attributes {stable_mosaic.version = 11 : i64} {
  func.func @kernel(%arg0: i32, %arg1: memref<8x8x128xf32, #tpu.memory_space<vmem>>, %arg2: memref<128x128xf32, #tpu.memory_space<vmem>>, %arg3: memref<8x128xf32, #tpu.memory_space<vmem>>, %arg4: memref<8x8x128xf32, #tpu.memory_space<vmem>>, %arg5: memref<8x128xf32, #tpu.memory_space<vmem>>) attributes {dimension_semantics = [#tpu.dimension_semantics<arbitrary>], iteration_bounds = array<i64: 1>, scalar_prefetch = 0 : i64, scratch_operands = 1 : i64, tpu.core_type = #tpu.core_type<tc>, window_params = [{transform_indices = @transform_0, window_bounds = array<i64: 8, 8, 128>}, {pipeline_mode = #tpu.pipeline_mode<synchronous>, transform_indices = @transform_1, window_bounds = array<i64: 128, 128>}, {pipeline_mode = #tpu.pipeline_mode<synchronous>, transform_indices = @transform_2, window_bounds = array<i64: 8, 128>}, {transform_indices = @transform_3, window_bounds = array<i64: 8, 8, 128>}]} {
    %c0_i32 = arith.constant 0 : i32
    %0 = arith.cmpi eq, %arg0, %c0_i32 : i32
    %1 = arith.extui %0 : i1 to i32
    %c0_i32_0 = arith.constant 0 : i32
    %2 = arith.cmpi ne, %1, %c0_i32_0 : i32
    scf.if %2 {
      %c0_46 = arith.constant 0 : index
      %c0_47 = arith.constant 0 : index
      %86 = vector.load %arg3[%c0_46, %c0_47] : memref<8x128xf32, #tpu.memory_space<vmem>>, vector<8x128xf32>
      %c0_48 = arith.constant 0 : index
      %c0_49 = arith.constant 0 : index
      %87 = vector.load %arg5[%c0_48, %c0_49] : memref<8x128xf32, #tpu.memory_space<vmem>>, vector<8x128xf32>
      tpu.vector_store %arg5[%c0_48, %c0_49], %86 {strides = array<i32>} : memref<8x128xf32, #tpu.memory_space<vmem>>, vector<8x128xf32>,
    } else {
    }
    %c0 = arith.constant 0 : index
    %c0_1 = arith.constant 0 : index
    %3 = vector.load %arg2[%c0, %c0_1] : memref<128x128xf32, #tpu.memory_space<vmem>>, vector<128x128xf32>
    %c0_2 = arith.constant 0 : index
    %c0_3 = arith.constant 0 : index
    %4 = vector.load %arg5[%c0_2, %c0_3] : memref<8x128xf32, #tpu.memory_space<vmem>>, vector<8x128xf32>
    %c0_i32_4 = arith.constant 0 : i32
    %5 = arith.index_cast %c0_i32_4 : i32 to index
    %c0_5 = arith.constant 0 : index
    %c0_6 = arith.constant 0 : index
    %6 = vector.load %arg1[%5, %c0_5, %c0_6] : memref<8x8x128xf32, #tpu.memory_space<vmem>>, vector<1x8x128xf32>
    %7 = vector.shape_cast %6 : vector<1x8x128xf32> to vector<8x128xf32>
    %cst = arith.constant dense<0.000000e+00> : vector<8x128xf32>
    %8 = tpu.matmul %4, %3, %cst {dimension_numbers = #tpu.dot_dimension_numbers<[1], [0], [0], [1], [0, 0, 1, 1], [], []>} : vector<8x128xf32>, vector<128x128xf32>, vector<8x128xf32> -> vector<8x128xf32>
    %9 = arith.addf %7, %8 : vector<8x128xf32>
    %10 = math.tanh %9 : vector<8x128xf32>
    %11 = arith.index_cast %c0_i32_4 : i32 to index
    %c0_7 = arith.constant 0 : index
    %c0_8 = arith.constant 0 : index
    %12 = vector.load %arg4[%11, %c0_7, %c0_8] : memref<8x8x128xf32, #tpu.memory_space<vmem>>, vector<1x8x128xf32>
    %13 = vector.shape_cast %12 : vector<1x8x128xf32> to vector<8x128xf32>
    %14 = vector.shape_cast %10 : vector<8x128xf32> to vector<1x8x128xf32>
    tpu.vector_store %arg4[%11, %c0_7, %c0_8], %14 {strides = array<i32>} : memref<8x8x128xf32, #tpu.memory_space<vmem>>, vector<1x8x128xf32>,
    %c1_i32 = arith.constant 1 : i32
    %15 = arith.index_cast %c1_i32 : i32 to index
    %c0_9 = arith.constant 0 : index
    %c0_10 = arith.constant 0 : index
    %16 = vector.load %arg1[%15, %c0_9, %c0_10] : memref<8x8x128xf32, #tpu.memory_space<vmem>>, vector<1x8x128xf32>
    %17 = vector.shape_cast %16 : vector<1x8x128xf32> to vector<8x128xf32>
    %cst_11 = arith.constant dense<0.000000e+00> : vector<8x128xf32>
    %18 = tpu.matmul %10, %3, %cst_11 {dimension_numbers = #tpu.dot_dimension_numbers<[1], [0], [0], [1], [0, 0, 1, 1], [], []>} : vector<8x128xf32>, vector<128x128xf32>, vector<8x128xf32> -> vector<8x128xf32>
    %19 = arith.addf %17, %18 : vector<8x128xf32>
    %20 = math.tanh %19 : vector<8x128xf32>
    %21 = arith.index_cast %c1_i32 : i32 to index
    %c0_12 = arith.constant 0 : index
    %c0_13 = arith.constant 0 : index
    %22 = vector.load %arg4[%21, %c0_12, %c0_13] : memref<8x8x128xf32, #tpu.memory_space<vmem>>, vector<1x8x128xf32>
    %23 = vector.shape_cast %22 : vector<1x8x128xf32> to vector<8x128xf32>
    %24 = vector.shape_cast %20 : vector<8x128xf32> to vector<1x8x128xf32>
    tpu.vector_store %arg4[%21, %c0_12, %c0_13], %24 {strides = array<i32>} : memref<8x8x128xf32, #tpu.memory_space<vmem>>, vector<1x8x128xf32>,
    %c2_i32 = arith.constant 2 : i32
    %25 = arith.index_cast %c2_i32 : i32 to index
    %c0_14 = arith.constant 0 : index
    %c0_15 = arith.constant 0 : index
    %26 = vector.load %arg1[%25, %c0_14, %c0_15] : memref<8x8x128xf32, #tpu.memory_space<vmem>>, vector<1x8x128xf32>
    %27 = vector.shape_cast %26 : vector<1x8x128xf32> to vector<8x128xf32>
    %cst_16 = arith.constant dense<0.000000e+00> : vector<8x128xf32>
    %28 = tpu.matmul %20, %3, %cst_16 {dimension_numbers = #tpu.dot_dimension_numbers<[1], [0], [0], [1], [0, 0, 1, 1], [], []>} : vector<8x128xf32>, vector<128x128xf32>, vector<8x128xf32> -> vector<8x128xf32>
    %29 = arith.addf %27, %28 : vector<8x128xf32>
    %30 = math.tanh %29 : vector<8x128xf32>
    %31 = arith.index_cast %c2_i32 : i32 to index
    %c0_17 = arith.constant 0 : index
    %c0_18 = arith.constant 0 : index
    %32 = vector.load %arg4[%31, %c0_17, %c0_18] : memref<8x8x128xf32, #tpu.memory_space<vmem>>, vector<1x8x128xf32>
    %33 = vector.shape_cast %32 : vector<1x8x128xf32> to vector<8x128xf32>
    %34 = vector.shape_cast %30 : vector<8x128xf32> to vector<1x8x128xf32>
    tpu.vector_store %arg4[%31, %c0_17, %c0_18], %34 {strides = array<i32>} : memref<8x8x128xf32, #tpu.memory_space<vmem>>, vector<1x8x128xf32>,
    %c3_i32 = arith.constant 3 : i32
    %35 = arith.index_cast %c3_i32 : i32 to index
    %c0_19 = arith.constant 0 : index
    %c0_20 = arith.constant 0 : index
    %36 = vector.load %arg1[%35, %c0_19, %c0_20] : memref<8x8x128xf32, #tpu.memory_space<vmem>>, vector<1x8x128xf32>
    %37 = vector.shape_cast %36 : vector<1x8x128xf32> to vector<8x128xf32>
    %cst_21 = arith.constant dense<0.000000e+00> : vector<8x128xf32>
    %38 = tpu.matmul %30, %3, %cst_21 {dimension_numbers = #tpu.dot_dimension_numbers<[1], [0], [0], [1], [0, 0, 1, 1], [], []>} : vector<8x128xf32>, vector<128x128xf32>, vector<8x128xf32> -> vector<8x128xf32>
    %39 = arith.addf %37, %38 : vector<8x128xf32>
    %40 = math.tanh %39 : vector<8x128xf32>
    %41 = arith.index_cast %c3_i32 : i32 to index
    %c0_22 = arith.constant 0 : index
    %c0_23 = arith.constant 0 : index
    %42 = vector.load %arg4[%41, %c0_22, %c0_23] : memref<8x8x128xf32, #tpu.memory_space<vmem>>, vector<1x8x128xf32>
    %43 = vector.shape_cast %42 : vector<1x8x128xf32> to vector<8x128xf32>
    %44 = vector.shape_cast %40 : vector<8x128xf32> to vector<1x8x128xf32>
    tpu.vector_store %arg4[%41, %c0_22, %c0_23], %44 {strides = array<i32>} : memref<8x8x128xf32, #tpu.memory_space<vmem>>, vector<1x8x128xf32>,
    %c4_i32 = arith.constant 4 : i32
    %45 = arith.index_cast %c4_i32 : i32 to index
    %c0_24 = arith.constant 0 : index
    %c0_25 = arith.constant 0 : index
    %46 = vector.load %arg1[%45, %c0_24, %c0_25] : memref<8x8x128xf32, #tpu.memory_space<vmem>>, vector<1x8x128xf32>
    %47 = vector.shape_cast %46 : vector<1x8x128xf32> to vector<8x128xf32>
    %cst_26 = arith.constant dense<0.000000e+00> : vector<8x128xf32>
    %48 = tpu.matmul %40, %3, %cst_26 {dimension_numbers = #tpu.dot_dimension_numbers<[1], [0], [0], [1], [0, 0, 1, 1], [], []>} : vector<8x128xf32>, vector<128x128xf32>, vector<8x128xf32> -> vector<8x128xf32>
    %49 = arith.addf %47, %48 : vector<8x128xf32>
    %50 = math.tanh %49 : vector<8x128xf32>
    %51 = arith.index_cast %c4_i32 : i32 to index
    %c0_27 = arith.constant 0 : index
    %c0_28 = arith.constant 0 : index
    %52 = vector.load %arg4[%51, %c0_27, %c0_28] : memref<8x8x128xf32, #tpu.memory_space<vmem>>, vector<1x8x128xf32>
    %53 = vector.shape_cast %52 : vector<1x8x128xf32> to vector<8x128xf32>
    %54 = vector.shape_cast %50 : vector<8x128xf32> to vector<1x8x128xf32>
    tpu.vector_store %arg4[%51, %c0_27, %c0_28], %54 {strides = array<i32>} : memref<8x8x128xf32, #tpu.memory_space<vmem>>, vector<1x8x128xf32>,
    %c5_i32 = arith.constant 5 : i32
    %55 = arith.index_cast %c5_i32 : i32 to index
    %c0_29 = arith.constant 0 : index
    %c0_30 = arith.constant 0 : index
    %56 = vector.load %arg1[%55, %c0_29, %c0_30] : memref<8x8x128xf32, #tpu.memory_space<vmem>>, vector<1x8x128xf32>
    %57 = vector.shape_cast %56 : vector<1x8x128xf32> to vector<8x128xf32>
    %cst_31 = arith.constant dense<0.000000e+00> : vector<8x128xf32>
    %58 = tpu.matmul %50, %3, %cst_31 {dimension_numbers = #tpu.dot_dimension_numbers<[1], [0], [0], [1], [0, 0, 1, 1], [], []>} : vector<8x128xf32>, vector<128x128xf32>, vector<8x128xf32> -> vector<8x128xf32>
    %59 = arith.addf %57, %58 : vector<8x128xf32>
    %60 = math.tanh %59 : vector<8x128xf32>
    %61 = arith.index_cast %c5_i32 : i32 to index
    %c0_32 = arith.constant 0 : index
    %c0_33 = arith.constant 0 : index
    %62 = vector.load %arg4[%61, %c0_32, %c0_33] : memref<8x8x128xf32, #tpu.memory_space<vmem>>, vector<1x8x128xf32>
    %63 = vector.shape_cast %62 : vector<1x8x128xf32> to vector<8x128xf32>
    %64 = vector.shape_cast %60 : vector<8x128xf32> to vector<1x8x128xf32>
    tpu.vector_store %arg4[%61, %c0_32, %c0_33], %64 {strides = array<i32>} : memref<8x8x128xf32, #tpu.memory_space<vmem>>, vector<1x8x128xf32>,
    %c6_i32 = arith.constant 6 : i32
    %65 = arith.index_cast %c6_i32 : i32 to index
    %c0_34 = arith.constant 0 : index
    %c0_35 = arith.constant 0 : index
    %66 = vector.load %arg1[%65, %c0_34, %c0_35] : memref<8x8x128xf32, #tpu.memory_space<vmem>>, vector<1x8x128xf32>
    %67 = vector.shape_cast %66 : vector<1x8x128xf32> to vector<8x128xf32>
    %cst_36 = arith.constant dense<0.000000e+00> : vector<8x128xf32>
    %68 = tpu.matmul %60, %3, %cst_36 {dimension_numbers = #tpu.dot_dimension_numbers<[1], [0], [0], [1], [0, 0, 1, 1], [], []>} : vector<8x128xf32>, vector<128x128xf32>, vector<8x128xf32> -> vector<8x128xf32>
    %69 = arith.addf %67, %68 : vector<8x128xf32>
    %70 = math.tanh %69 : vector<8x128xf32>
    %71 = arith.index_cast %c6_i32 : i32 to index
    %c0_37 = arith.constant 0 : index
    %c0_38 = arith.constant 0 : index
    %72 = vector.load %arg4[%71, %c0_37, %c0_38] : memref<8x8x128xf32, #tpu.memory_space<vmem>>, vector<1x8x128xf32>
    %73 = vector.shape_cast %72 : vector<1x8x128xf32> to vector<8x128xf32>
    %74 = vector.shape_cast %70 : vector<8x128xf32> to vector<1x8x128xf32>
    tpu.vector_store %arg4[%71, %c0_37, %c0_38], %74 {strides = array<i32>} : memref<8x8x128xf32, #tpu.memory_space<vmem>>, vector<1x8x128xf32>,
    %c7_i32 = arith.constant 7 : i32
    %75 = arith.index_cast %c7_i32 : i32 to index
    %c0_39 = arith.constant 0 : index
    %c0_40 = arith.constant 0 : index
    %76 = vector.load %arg1[%75, %c0_39, %c0_40] : memref<8x8x128xf32, #tpu.memory_space<vmem>>, vector<1x8x128xf32>
    %77 = vector.shape_cast %76 : vector<1x8x128xf32> to vector<8x128xf32>
    %cst_41 = arith.constant dense<0.000000e+00> : vector<8x128xf32>
    %78 = tpu.matmul %70, %3, %cst_41 {dimension_numbers = #tpu.dot_dimension_numbers<[1], [0], [0], [1], [0, 0, 1, 1], [], []>} : vector<8x128xf32>, vector<128x128xf32>, vector<8x128xf32> -> vector<8x128xf32>
    %79 = arith.addf %77, %78 : vector<8x128xf32>
    %80 = math.tanh %79 : vector<8x128xf32>
    %81 = arith.index_cast %c7_i32 : i32 to index
    %c0_42 = arith.constant 0 : index
    %c0_43 = arith.constant 0 : index
    %82 = vector.load %arg4[%81, %c0_42, %c0_43] : memref<8x8x128xf32, #tpu.memory_space<vmem>>, vector<1x8x128xf32>
    %83 = vector.shape_cast %82 : vector<1x8x128xf32> to vector<8x128xf32>
    %84 = vector.shape_cast %80 : vector<8x128xf32> to vector<1x8x128xf32>
    tpu.vector_store %arg4[%81, %c0_42, %c0_43], %84 {strides = array<i32>} : memref<8x8x128xf32, #tpu.memory_space<vmem>>, vector<1x8x128xf32>,
    %c8_i32 = arith.constant 8 : i32
    %c0_44 = arith.constant 0 : index
    %c0_45 = arith.constant 0 : index
    %85 = vector.load %arg5[%c0_44, %c0_45] : memref<8x128xf32, #tpu.memory_space<vmem>>, vector<8x128xf32>
    tpu.vector_store %arg5[%c0_44, %c0_45], %80 {strides = array<i32>} : memref<8x128xf32, #tpu.memory_space<vmem>>, vector<8x128xf32>,
    return
  }
  func.func @transform_0(%arg0: i32) -> (i32, i32, i32) {
    %c0_i32 = arith.constant 0 : i32
    %c0_i32_0 = arith.constant 0 : i32
    %c0_i32_1 = arith.constant 0 : i32
    return %arg0, %c0_i32, %c0_i32_0 : i32, i32, i32
  }
  func.func @transform_1(%arg0: i32) -> (i32, i32) {
    %c0_i32 = arith.constant 0 : i32
    %c0_i32_0 = arith.constant 0 : i32
    %c0_i32_1 = arith.constant 0 : i32
    return %c0_i32, %c0_i32_0 : i32, i32
  }
  func.func @transform_2(%arg0: i32) -> (i32, i32) {
    %c0_i32 = arith.constant 0 : i32
    %c0_i32_0 = arith.constant 0 : i32
    %c0_i32_1 = arith.constant 0 : i32
    return %c0_i32, %c0_i32_0 : i32, i32
  }
  func.func @transform_3(%arg0: i32) -> (i32, i32, i32) {
    %c0_i32 = arith.constant 0 : i32
    %c0_i32_0 = arith.constant 0 : i32
    %c0_i32_1 = arith.constant 0 : i32
    return %arg0, %c0_i32, %c0_i32_0 : i32, i32, i32
  }
}

</mosaic_0001>

<bundles_post_ra>
// kernel: tpu_custom_call.1
= control target key start
LH: loop header
LB: loop body
LE: loop exit
PB: predicated region body
PF: predicated region fallthrough
CT: control target
= control target key end

     0   :  { %8 = vsyncpa [#allocation4], 0  ;;  %s641_s0 = inlined_call_operand.hbm [shape: f32[8,8,128], index: 0, kind: input, shape index: {}]   ;;  %s642_s1 = inlined_call_operand.hbm [shape: f32[128,128], index: 1, kind: input, shape index: {}]   ;;  %s643_s2 = inlined_call_operand.hbm [shape: f32[8,128], index: 2, kind: input, shape index: {}]   ;;  %s644_s3 = inlined_call_operand.hbm [shape: f32[8,8,128], index: 3, kind: output, shape index: {}]  }
   0x1   :  { %9 = vsyncpa [#allocation7], 0 }
   0x2   :  { %10 = vsyncpa [#allocation5], 0  ;;  %s28_s14 = sshll.u32 %s642_s1, 4  ;;  %s434_s15 = smov [#allocation6]   ;;  %s29_s14 = int_to_ptr.hbm [resolvable:$true] %s28_s14 }
   0x3   :  { %s30_s16 = sshll.u32 %s434_s15, 4  ;;  %s15_s19 = sshll.u32 %s641_s0, 4  ;;  %s31_s16 = int_to_ptr.vmem [resolvable:$true] %s30_s16  ;;  %s16_s19 = int_to_ptr.hbm [resolvable:$true] %s15_s19 }
   0x4   :  { %s435_s20 = smov 128   ;;  %s436_s21 = smov 8  }
   0x5   :  { %36 = dma.hbm_to_vmem [thread:$0]  %s29_s14, 2048, %s31_s16, [#allocation7], %s435_s20, %s435_s20, %s436_s21  }
   0x6   :  { %s437_s22 = smov [#allocation3]   ;;  %s42_s1 = sshll.u32 %s643_s2, 4  ;;  %s43_s1 = int_to_ptr.hbm [resolvable:$true] %s42_s1 }
   0x7   :  { %s17_s23 = sshll.u32 %s437_s22, 4  ;;  %s438_s0 = smov [#allocation8]   ;;  %s18_s23 = int_to_ptr.vmem [resolvable:$true] %s17_s23 }
   0x8   :  { %23 = dma.hbm_to_vmem [thread:$0]  %s16_s19, 1024, %s18_s23, [#allocation4], %s435_s20, %s435_s20, %s436_s21  }
   0x9   :  { %s44_s26 = sshll.u32 %s438_s0, 4  ;;  %s45_s26 = int_to_ptr.vmem [resolvable:$true] %s44_s26 }
   0xa   :  { %47 = dma.hbm_to_vmem [thread:$0]  %s43_s1, 128, %s45_s26, [#allocation7]  }
   0xb   :  { %428 = dma.done.wait [#allocation4], 1024  }
   0xc   :  { %429 = vsyncadd [#allocation4], 4294966272 }
   0xd   :  { %430 = dma.done.wait [#allocation7], 2176  }
   0xe   :  { %431 = vsyncadd [#allocation7], 4294965120  ;;  %v475_v0 = vld [vmem:[#allocation6 + $0x78] sm:$0xff]  ;;  %v477_v1 = vld [vmem:[#allocation6 + $0x70] sm:$0xff]  ;;  %s439_s2 = smov [#allocation9]   ;;  %s296_s30 = sshll.u32 %s644_s3, 4  ;;  %s297_s30 = int_to_ptr.hbm [resolvable:$true] %s296_s30 }
   0xf   :  { %84 = vmatpush.msra.mxu0 %v475_v0  ;;  %109 = vmatpush.msra.mxu1 %v475_v0  ;;  %v481_v2 = vld [vmem:[#allocation6 + $0x68] sm:$0xff]  ;;  %v487_v3 = vld [vmem:[#allocation6 + $0x60] sm:$0xff]  ;;  %v493_v4 = vld [vmem:[#allocation6 + $0x58] sm:$0xff]  ;;  %s294_s27 = sshll.u32 %s439_s2, 4  ;;  %s295_s27 = int_to_ptr.vmem [resolvable:$true] %s294_s27 }
  0x10   :  { %135 = vmatpush.msra.mxu2 %v475_v0  ;;  %161 = vmatpush.msra.mxu3 %v475_v0  ;;  %v499_v5 = vld [vmem:[#allocation6 + $0x50] sm:$0xff]  ;;  %v505_v6 = vld [vmem:[#allocation6 + $0x48] sm:$0xff]  ;;  %v511_v7 = vld [vmem:[#allocation6 + $0x40] sm:$0xff] }
  0x11   :  { %85 = vmatpush.msra.mxu0 %v477_v1  ;;  %110 = vmatpush.msra.mxu1 %v477_v1  ;;  %v517_v8 = vld [vmem:[#allocation6 + $0x38] sm:$0xff]  ;;  %v523_v9 = vld [vmem:[#allocation6 + $0x30] sm:$0xff]  ;;  %v529_v10 = vld [vmem:[#allocation6 + $0x28] sm:$0xff] }
  0x12   :  { %136 = vmatpush.msra.mxu2 %v477_v1  ;;  %162 = vmatpush.msra.mxu3 %v477_v1  ;;  %v535_v11 = vld [vmem:[#allocation6 + $0x20] sm:$0xff]  ;;  %v541_v12 = vld [vmem:[#allocation6 + $0x18] sm:$0xff]  ;;  %v547_v13 = vld [vmem:[#allocation6 + $0x10] sm:$0xff] }
  0x13   :  { %86 = vmatpush.msra.mxu0 %v481_v2  ;;  %111 = vmatpush.msra.mxu1 %v481_v2  ;;  %v553_v14 = vld [vmem:[#allocation6 + $0x8] sm:$0xff]  ;;  %v559_v15 = vld [vmem:[#allocation6] sm:$0xff]  ;;  %v134_v25 = vld [vmem:[#allocation3 + $0x10] sm:$0xff] }
  0x14   :  { %137 = vmatpush.msra.mxu2 %v481_v2  ;;  %163 = vmatpush.msra.mxu3 %v481_v2  ;;  %v64_v16 = vld [vmem:[#allocation8] sm:$0xff]  ;;  %v108_v21 = vld [vmem:[#allocation3 + $0x8] sm:$0xff]  ;;  %v160_v29 = vld [vmem:[#allocation3 + $0x18] sm:$0xff] }
  0x15   :  { %87 = vmatpush.msra.mxu0 %v487_v3  ;;  %112 = vmatpush.msra.mxu1 %v487_v3  ;;  %v83_v17 = vld [vmem:[#allocation3] sm:$0xff]  ;;  %v212_v37 = vld [vmem:[#allocation3 + $0x28] sm:$0xff]  ;;  %v238_v41 = vld [vmem:[#allocation3 + $0x30] sm:$0xff] }
  0x16   :  { %138 = vmatpush.msra.mxu2 %v487_v3  ;;  %164 = vmatpush.msra.mxu3 %v487_v3  ;;  %v186_v33 = vld [vmem:[#allocation3 + $0x20] sm:$0xff]  ;;  %v264_v45 = vld [vmem:[#allocation3 + $0x38] sm:$0xff] }
  0x17   :  { %88 = vmatpush.msra.mxu0 %v493_v4  ;;  %113 = vmatpush.msra.mxu1 %v493_v4 }
  0x18   :  { %139 = vmatpush.msra.mxu2 %v493_v4  ;;  %165 = vmatpush.msra.mxu3 %v493_v4 }
  0x19   :  { %89 = vmatpush.msra.mxu0 %v499_v5  ;;  %114 = vmatpush.msra.mxu1 %v499_v5 }
  0x1a   :  { %140 = vmatpush.msra.mxu2 %v499_v5  ;;  %166 = vmatpush.msra.mxu3 %v499_v5 }
  0x1b   :  { %90 = vmatpush.msra.mxu0 %v505_v6  ;;  %115 = vmatpush.msra.mxu1 %v505_v6 }
  0x1c   :  { %141 = vmatpush.msra.mxu2 %v505_v6  ;;  %167 = vmatpush.msra.mxu3 %v505_v6 }
  0x1d   :  { %91 = vmatpush.msra.mxu0 %v511_v7  ;;  %116 = vmatpush.msra.mxu1 %v511_v7 }
  0x1e   :  { %142 = vmatpush.msra.mxu2 %v511_v7  ;;  %168 = vmatpush.msra.mxu3 %v511_v7 }
  0x1f   :  { %92 = vmatpush.msra.mxu0 %v517_v8  ;;  %117 = vmatpush.msra.mxu1 %v517_v8 }
  0x20   :  { %143 = vmatpush.msra.mxu2 %v517_v8  ;;  %169 = vmatpush.msra.mxu3 %v517_v8 }
  0x21   :  { %93 = vmatpush.msra.mxu0 %v523_v9  ;;  %118 = vmatpush.msra.mxu1 %v523_v9 }
  0x22   :  { %144 = vmatpush.msra.mxu2 %v523_v9  ;;  %170 = vmatpush.msra.mxu3 %v523_v9 }
  0x23   :  { %94 = vmatpush.msra.mxu0 %v529_v10  ;;  %119 = vmatpush.msra.mxu1 %v529_v10 }
  0x24   :  { %145 = vmatpush.msra.mxu2 %v529_v10  ;;  %171 = vmatpush.msra.mxu3 %v529_v10 }
  0x25   :  { %95 = vmatpush.msra.mxu0 %v535_v11  ;;  %120 = vmatpush.msra.mxu1 %v535_v11 }
  0x26   :  { %146 = vmatpush.msra.mxu2 %v535_v11  ;;  %172 = vmatpush.msra.mxu3 %v535_v11 }
  0x27   :  { %96 = vmatpush.msra.mxu0 %v541_v12  ;;  %121 = vmatpush.msra.mxu1 %v541_v12 }
  0x28   :  { %147 = vmatpush.msra.mxu2 %v541_v12  ;;  %173 = vmatpush.msra.mxu3 %v541_v12 }
  0x29   :  { %97 = vmatpush.msra.mxu0 %v547_v13  ;;  %122 = vmatpush.msra.mxu1 %v547_v13 }
  0x2a   :  { %148 = vmatpush.msra.mxu2 %v547_v13  ;;  %174 = vmatpush.msra.mxu3 %v547_v13 }
  0x2b   :  { %98 = vmatpush.msra.mxu0 %v553_v14  ;;  %123 = vmatpush.msra.mxu1 %v553_v14 }
  0x2c   :  { %149 = vmatpush.msra.mxu2 %v553_v14  ;;  %175 = vmatpush.msra.mxu3 %v553_v14 }
  0x2d   :  { %99 = vmatpush.msra.mxu0 %v559_v15  ;;  %124 = vmatpush.msra.mxu1 %v559_v15 }
  0x2e   :  { %100 = vmatmul.f32.vlgmr.msra.gmra.mxu0 %v64_v16  ;;  %150 = vmatpush.msra.mxu2 %v559_v15 }
  0x2f   :  { %176 = vmatpush.msra.mxu3 %v559_v15  ;;  %187 = vmatpush.msrb.mxu0 %v475_v0 }
  0x30   :  { %213 = vmatpush.msrb.mxu1 %v475_v0  ;;  %239 = vmatpush.msrb.mxu2 %v475_v0 }
  0x31   :  { %188 = vmatpush.msrb.mxu0 %v477_v1  ;;  %265 = vmatpush.msrb.mxu3 %v475_v0 }
  0x32   :  { %214 = vmatpush.msrb.mxu1 %v477_v1  ;;  %240 = vmatpush.msrb.mxu2 %v477_v1 }
  0x33   :  { %189 = vmatpush.msrb.mxu0 %v481_v2  ;;  %266 = vmatpush.msrb.mxu3 %v477_v1 }
  0x34   :  { %215 = vmatpush.msrb.mxu1 %v481_v2  ;;  %241 = vmatpush.msrb.mxu2 %v481_v2 }
  0x35   :  { %190 = vmatpush.msrb.mxu0 %v487_v3  ;;  %267 = vmatpush.msrb.mxu3 %v481_v2 }
  0x36   :  { %216 = vmatpush.msrb.mxu1 %v487_v3  ;;  %242 = vmatpush.msrb.mxu2 %v487_v3 }
  0x37   :  { %191 = vmatpush.msrb.mxu0 %v493_v4  ;;  %268 = vmatpush.msrb.mxu3 %v487_v3 }
  0x38   :  { %217 = vmatpush.msrb.mxu1 %v493_v4  ;;  %243 = vmatpush.msrb.mxu2 %v493_v4 }
  0x39   :  { %192 = vmatpush.msrb.mxu0 %v499_v5  ;;  %269 = vmatpush.msrb.mxu3 %v493_v4 }
  0x3a   :  { %218 = vmatpush.msrb.mxu1 %v499_v5  ;;  %244 = vmatpush.msrb.mxu2 %v499_v5 }
  0x3b   :  { %193 = vmatpush.msrb.mxu0 %v505_v6  ;;  %270 = vmatpush.msrb.mxu3 %v499_v5 }
  0x3c   :  { %219 = vmatpush.msrb.mxu1 %v505_v6  ;;  %245 = vmatpush.msrb.mxu2 %v505_v6 }
  0x3d   :  { %194 = vmatpush.msrb.mxu0 %v511_v7  ;;  %271 = vmatpush.msrb.mxu3 %v505_v6 }
  0x3e   :  { %220 = vmatpush.msrb.mxu1 %v511_v7  ;;  %246 = vmatpush.msrb.mxu2 %v511_v7 }
  0x3f   :  { %195 = vmatpush.msrb.mxu0 %v517_v8  ;;  %272 = vmatpush.msrb.mxu3 %v511_v7 }
  0x40   :  { %221 = vmatpush.msrb.mxu1 %v517_v8  ;;  %247 = vmatpush.msrb.mxu2 %v517_v8 }
  0x41   :  { %196 = vmatpush.msrb.mxu0 %v523_v9  ;;  %273 = vmatpush.msrb.mxu3 %v517_v8 }
  0x42   :  { %222 = vmatpush.msrb.mxu1 %v523_v9  ;;  %248 = vmatpush.msrb.mxu2 %v523_v9 }
  0x43   :  { %197 = vmatpush.msrb.mxu0 %v529_v10  ;;  %274 = vmatpush.msrb.mxu3 %v523_v9 }
  0x44   :  { %223 = vmatpush.msrb.mxu1 %v529_v10  ;;  %249 = vmatpush.msrb.mxu2 %v529_v10 }
  0x45   :  { %198 = vmatpush.msrb.mxu0 %v535_v11  ;;  %275 = vmatpush.msrb.mxu3 %v529_v10 }
  0x46   :  { %224 = vmatpush.msrb.mxu1 %v535_v11  ;;  %250 = vmatpush.msrb.mxu2 %v535_v11 }
  0x47   :  { %199 = vmatpush.msrb.mxu0 %v541_v12  ;;  %276 = vmatpush.msrb.mxu3 %v535_v11 }
  0x48   :  { %225 = vmatpush.msrb.mxu1 %v541_v12  ;;  %251 = vmatpush.msrb.mxu2 %v541_v12 }
  0x49   :  { %200 = vmatpush.msrb.mxu0 %v547_v13  ;;  %277 = vmatpush.msrb.mxu3 %v541_v12 }
  0x4a   :  { %226 = vmatpush.msrb.mxu1 %v547_v13  ;;  %252 = vmatpush.msrb.mxu2 %v547_v13 }
  0x4b   :  { %201 = vmatpush.msrb.mxu0 %v553_v14  ;;  %278 = vmatpush.msrb.mxu3 %v547_v13 }
  0x4c   :  { %227 = vmatpush.msrb.mxu1 %v553_v14  ;;  %253 = vmatpush.msrb.mxu2 %v553_v14 }
  0x4d   :  { %202 = vmatpush.msrb.mxu0 %v559_v15  ;;  %279 = vmatpush.msrb.mxu3 %v553_v14 }
  0x4e   :  { %228 = vmatpush.msrb.mxu1 %v559_v15  ;;  %254 = vmatpush.msrb.mxu2 %v559_v15 }
  0x4f   :  { %280 = vmatpush.msrb.mxu3 %v559_v15 }
  0xab   :  { %v101_v18 = vpop.f32.mrf.mxu0 }
  0xac   :  { %v104_v19 = vadd.f32 %v101_v18, %v83_v17 }
  0xae   :  { %316 = vtanh.f32 %v104_v19 }
  0xb4   :  { %v317_v20 = vpop.eup %316 }
  0xb5   :  { %106 = vst [vmem:[#allocation9] sm:$0xff] %v317_v20  ;;  %125 = vmatmul.f32.vlgmr.msra.gmra.mxu1 %v317_v20 }
 0x132   :  { %v126_v22 = vpop.f32.mrf.mxu1 }
 0x133   :  { %v129_v23 = vadd.f32 %v126_v22, %v108_v21 }
 0x135   :  { %318 = vtanh.f32 %v129_v23 }
 0x13b   :  { %v319_v24 = vpop.eup %318 }
 0x13c   :  { %132 = vst [vmem:[#allocation9 + $0x8] sm:$0xff] %v319_v24  ;;  %151 = vmatmul.f32.vlgmr.msra.gmra.mxu2 %v319_v24 }
 0x1bf   :  { %v152_v26 = vpop.f32.mrf.mxu2 }
 0x1c0   :  { %v155_v27 = vadd.f32 %v152_v26, %v134_v25 }
 0x1c2   :  { %320 = vtanh.f32 %v155_v27 }
 0x1c8   :  { %v321_v28 = vpop.eup %320 }
 0x1c9   :  { %158 = vst [vmem:[#allocation9 + $0x10] sm:$0xff] %v321_v28  ;;  %177 = vmatmul.f32.vlgmr.msra.gmra.mxu3 %v321_v28 }
 0x24c   :  { %v178_v30 = vpop.f32.mrf.mxu3 }
 0x24d   :  { %v181_v31 = vadd.f32 %v178_v30, %v160_v29 }
 0x24f   :  { %322 = vtanh.f32 %v181_v31 }
 0x255   :  { %v323_v32 = vpop.eup %322 }
 0x256   :  { %184 = vst [vmem:[#allocation9 + $0x18] sm:$0xff] %v323_v32  ;;  %203 = vmatmul.f32.vlgmr.msrb.gmra.mxu0 %v323_v32 }
 0x2d3   :  { %v204_v34 = vpop.f32.mrf.mxu0 }
 0x2d4   :  { %v207_v35 = vadd.f32 %v204_v34, %v186_v33 }
 0x2d6   :  { %324 = vtanh.f32 %v207_v35 }
 0x2dc   :  { %v325_v36 = vpop.eup %324 }
 0x2dd   :  { %210 = vst [vmem:[#allocation9 + $0x20] sm:$0xff] %v325_v36  ;;  %229 = vmatmul.f32.vlgmr.msrb.gmra.mxu1 %v325_v36 }
 0x35a   :  { %v230_v38 = vpop.f32.mrf.mxu1 }
 0x35b   :  { %v233_v39 = vadd.f32 %v230_v38, %v212_v37 }
 0x35d   :  { %326 = vtanh.f32 %v233_v39 }
 0x363   :  { %v327_v40 = vpop.eup %326 }
 0x364   :  { %236 = vst [vmem:[#allocation9 + $0x28] sm:$0xff] %v327_v40  ;;  %255 = vmatmul.f32.vlgmr.msrb.gmra.mxu2 %v327_v40 }
 0x3e7   :  { %v256_v42 = vpop.f32.mrf.mxu2 }
 0x3e8   :  { %v259_v43 = vadd.f32 %v256_v42, %v238_v41 }
 0x3ea   :  { %328 = vtanh.f32 %v259_v43 }
 0x3f0   :  { %v329_v44 = vpop.eup %328 }
 0x3f1   :  { %262 = vst [vmem:[#allocation9 + $0x30] sm:$0xff] %v329_v44  ;;  %281 = vmatmul.f32.vlgmr.msrb.gmra.mxu3 %v329_v44 }
 0x474   :  { %v282_v46 = vpop.f32.mrf.mxu3 }
 0x475   :  { %v285_v47 = vadd.f32 %v282_v46, %v264_v45 }
 0x477   :  { %330 = vtanh.f32 %v285_v47 }
 0x47d   :  { %v331_v48 = vpop.eup %330 }
 0x47e   :  { %288 = vst [vmem:[#allocation9 + $0x38] sm:$0xff] %v331_v48 }
 0x47f   :  { %302 = dma.vmem_to_hbm [thread:$0]  %s295_s27, 1024, %s297_s30, [#allocation5], %s435_s20, %s435_s20, %s436_s21  }
 0x480   :  { %432 = dma.done.wait [#allocation5], 1024  }
 0x481   :  { %433 = vsyncadd [#allocation5], 4294966272 }
 0x482   :  { %307 = vsyncpa [#allocation4], 1 }
 0x483   :  { %308 = vsyncpa [#allocation7], 1 }
 0x484   :  { %309 = vsyncpa [#allocation5], 1 }

</bundles_post_ra>
